<compile_context>
chip_gen: v7x
topology: tpu7x:2x2x1
jax: 0.10.0
libtpu: 0.0.40
codegen_flags: <defaults>
</compile_context>

<pallas_src>
import functools

import jax
import jax.numpy as jnp
from jax.experimental import pallas as pl
from jax.experimental.pallas import tpu as pltpu

EPS = 1e-5  # PyTorch BatchNorm default eps


def _full_vmem_specs(n):
    return [pl.BlockSpec(memory_space=pltpu.MemorySpace.VMEM) for _ in range(n)]


# ---------------------------------------------------------------------------
# Kernel 1: row-tiled conv GEMM + training-mode BatchNorm + ReLU
#           (optionally fused with a second 1x1x1 conv + BN + ReLU)
#   per-step inputs : patches tile (K, TR), weight (Cout, K), bias/gamma/beta (Cout,1)
#   resident output : (nrt, Cout, TR)  -- pre-BN tiles are staged here, the last
#                     grid step normalizes the whole buffer in place.
# ---------------------------------------------------------------------------
def _conv_bn_relu_kernel(*refs, fuse_second):
    if fuse_second:
        (p_ref, w_ref, b_ref, g_ref, be_ref,
         w2_ref, b2_ref, g2_ref, be2_ref, o_ref) = refs
    else:
        p_ref, w_ref, b_ref, g_ref, be_ref, o_ref = refs

    r = pl.program_id(0)
    # (Cout, K) @ (K, TR): rows live in lanes -> lane-dense output tile.
    y = jnp.dot(w_ref[...], p_ref[...], preferred_element_type=jnp.float32) + b_ref[...]
    o_ref[r] = y  # stage pre-BN tile in the resident output buffer

    @pl.when(r == pl.num_programs(0) - 1)
    def _finalize():
        yf = o_ref[...]                       # (nrt, Cout, TR): full pre-BN activations
        nrt, _, tr = yf.shape
        cnt = float(nrt * tr)

        def _bn_relu(z, gamma, beta):
            s1 = jnp.sum(jnp.sum(z, axis=2, keepdims=True), axis=0, keepdims=True)
            mean = s1 / cnt
            d = z - mean
            s2 = jnp.sum(jnp.sum(d * d, axis=2, keepdims=True), axis=0, keepdims=True)
            var = s2 / cnt                    # biased var (PyTorch train-mode forward)
            return jnp.maximum(d * jax.lax.rsqrt(var + EPS) * gamma + beta, 0.0)

        h = _bn_relu(yf, g_ref[...], be_ref[...])

        if fuse_second:
            # fused 1x1x1 conv: pure channel mix on the resident tiles
            w2 = w2_ref[...]                                  # (C2, C1)
            w2b = jnp.broadcast_to(w2[None], (nrt,) + w2.shape)
            y2 = jnp.einsum('noc,nct->not', w2b, h,
                            preferred_element_type=jnp.float32) + b2_ref[...]
            h = _bn_relu(y2, g2_ref[...], be2_ref[...])

        o_ref[...] = h


def _pick_row_tile(rows):
    for t in (1024, 512, 256, 128):
        if rows % t == 0 and rows // t >= 2:
            return t
    return rows


def conv3d_bn_relu(x, conv1, stride, padding, conv2=None):
    """BasicConv3d (optionally followed by a fused 1x1x1 BasicConv3d).  x: (B,C,T,H,W)."""
    w, b, g, be = conv1
    B, Cin, T, H, W = x.shape
    Cout = w.shape[0]
    kt, kh, kw = w.shape[2:]
    st, sh, sw = stride
    pt, ph, pw = padding

    xp = jnp.pad(x, ((0, 0), (0, 0), (pt, pt), (ph, ph), (pw, pw)))
    To = (T + 2 * pt - kt) // st + 1
    Ho = (H + 2 * ph - kh) // sh + 1
    Wo = (W + 2 * pw - kw) // sw + 1

    # TODO(synk): im2col is still assembled host-side (kt*kh*kw shifted views of the
    # padded input); fusing it into the kernel with a tap grid / element-offset
    # index_map would remove the K-fold HBM blow-up at large sizes.
    cols = []
    for i in range(kt):
        for j in range(kh):
            for l in range(kw):
                cols.append(xp[:, :, i:i + st * To:st, j:j + sh * Ho:sh, l:l + sw * Wo:sw])
    KK = kt * kh * kw
    K = Cin * KK
    rows = B * To * Ho * Wo
    patches = jnp.stack(cols, axis=2)                              # (B, Cin, KK, To, Ho, Wo)
    patches = patches.transpose(1, 2, 0, 3, 4, 5).reshape(K, rows)  # rows in lanes

    tr = _pick_row_tile(rows)
    nrt = rows // tr

    w2d = w.reshape(Cout, K)
    args = [patches, w2d,
            b.reshape(Cout, 1), g.reshape(Cout, 1), be.reshape(Cout, 1)]
    in_specs = [
        pl.BlockSpec((K, tr), lambda r: (0, r)),        # pipelined patch tiles
        pl.BlockSpec((Cout, K), lambda r: (0, 0)),
        pl.BlockSpec((Cout, 1), lambda r: (0, 0)),
        pl.BlockSpec((Cout, 1), lambda r: (0, 0)),
        pl.BlockSpec((Cout, 1), lambda r: (0, 0)),
    ]

    C2 = Cout
    if conv2 is not None:
        w2, b2, g2, be2 = conv2
        C2 = w2.shape[0]
        assert C2 == Cout and tuple(w2.shape[2:]) == (1, 1, 1)
        args += [w2.reshape(C2, Cout),
                 b2.reshape(C2, 1), g2.reshape(C2, 1), be2.reshape(C2, 1)]
        in_specs += [
            pl.BlockSpec((C2, Cout), lambda r: (0, 0)),
            pl.BlockSpec((C2, 1), lambda r: (0, 0)),
            pl.BlockSpec((C2, 1), lambda r: (0, 0)),
            pl.BlockSpec((C2, 1), lambda r: (0, 0)),
        ]

    out = pl.pallas_call(
        functools.partial(_conv_bn_relu_kernel, fuse_second=conv2 is not None),
        out_shape=jax.ShapeDtypeStruct((nrt, C2, tr), jnp.float32),
        grid=(nrt,),
        in_specs=in_specs,
        # constant index map -> output stays resident in VMEM across the grid
        out_specs=pl.BlockSpec((nrt, C2, tr), lambda r: (0, 0, 0)),
        compiler_params=pltpu.CompilerParams(dimension_semantics=("arbitrary",)),
    )(*args)

    out = out.transpose(1, 0, 2).reshape(C2, B, To, Ho, Wo)
    return out.transpose(1, 0, 2, 3, 4)


# ---------------------------------------------------------------------------
# Kernel 2: bilinear x2 upsample (align_corners=True) as two separable GEMMs
# ---------------------------------------------------------------------------
def _bilinear_matrix(n_in, n_out):
    """(n_out, n_in) interpolation matrix, align_corners=True semantics."""
    if n_out == 1:
        return jnp.zeros((1, n_in), jnp.float32).at[0, 0].set(1.0)
    src = jnp.arange(n_out, dtype=jnp.float32) * (n_in - 1) / (n_out - 1)
    lo = jnp.clip(jnp.floor(src).astype(jnp.int32), 0, max(n_in - 2, 0))
    frac = src - lo.astype(jnp.float32)
    hi = jnp.clip(lo + 1, 0, n_in - 1)
    rows = jnp.arange(n_out)
    mat = jnp.zeros((n_out, n_in), jnp.float32)
    mat = mat.at[rows, lo].add(1.0 - frac)
    mat = mat.at[rows, hi].add(frac)
    return mat


def _upsample_kernel(x_ref, lw_ref, lh_ref, o_ref):
    x = x_ref[...]                                   # (BC, H, W)
    lw = lw_ref[...]                                 # (W, Wo)
    lh = lh_ref[...]                                 # (Ho, H)
    BC = x.shape[0]
    lw_b = jnp.broadcast_to(lw[None], (BC,) + lw.shape)
    xw = jnp.einsum('nhw,nwv->nhv', x, lw_b, preferred_element_type=jnp.float32)
    lh_b = jnp.broadcast_to(lh[None], (BC,) + lh.shape)
    o_ref[...] = jnp.einsum('noh,nhv->nov', lh_b, xw, preferred_element_type=jnp.float32)


def bilinear_upsample_x2(x4d):
    """x4d: (B, C, H, W) -> (B, C, 2H, 2W), bilinear, align_corners=True."""
    B, C, H, W = x4d.shape
    Ho, Wo = 2 * H, 2 * W
    lw_t = _bilinear_matrix(W, Wo).T                 # (W, Wo)
    lh = _bilinear_matrix(H, Ho)                     # (Ho, H)
    out = pl.pallas_call(
        _upsample_kernel,
        out_shape=jax.ShapeDtypeStruct((B * C, Ho, Wo), jnp.float32),
        in_specs=_full_vmem_specs(3),
        out_specs=pl.BlockSpec(memory_space=pltpu.MemorySpace.VMEM),
    )(x4d.reshape(B * C, H, W), lw_t, lh)
    return out.reshape(B, C, Ho, Wo)


# ---------------------------------------------------------------------------
# Kernel 3: CMA_variant gating (+ fused residual add), fully fused.
#   Big tensors live in the lane-dense 2-D view (N*H, W*C); pooling / gate
#   expansion use small host-built constant matrices (reshape-free in-kernel).
# ---------------------------------------------------------------------------
def _cma_kernel(x_ref, res_ref, ssum_ref, ssumt_ref, hpool_ref, mask_ref, hexp_ref,
                w1_ref, b1_ref, g1_ref, be1_ref, w23_ref, b23_ref, o_ref,
                *, NH, W, oup):
    x = x_ref[...]                                   # (N*H, W*C)
    ssum = ssum_ref[...]                             # (W*C, C)
    ssum_t = ssumt_ref[...]                          # (C, W*C)
    mask = mask_ref[...]                             # (N*W, W*C)

    # pool over W  -> (N*H, C)
    xh = jnp.dot(x, ssum, preferred_element_type=jnp.float32) * (1.0 / W)
    # pool over H  -> (N*W, C)
    tmp = jnp.dot(hpool_ref[...], x, preferred_element_type=jnp.float32)   # (N*W, W*C)
    xw = jnp.dot(tmp * mask, ssum, preferred_element_type=jnp.float32)

    # conv1 (1x1) + BN(train) + ReLU on the concatenated [x_h ; x_w]
    y = jnp.concatenate([xh, xw], axis=0)            # (N*(H+W), C)
    y = jnp.dot(y, w1_ref[...], preferred_element_type=jnp.float32) + b1_ref[...]
    mean = jnp.mean(y, axis=0, keepdims=True)
    var = jnp.mean((y - mean) ** 2, axis=0, keepdims=True)
    y = jnp.maximum((y - mean) * jax.lax.rsqrt(var + EPS) * g1_ref[...] + be1_ref[...], 0.0)

    # conv2 / conv3 fused into a single GEMM against concat([w2, w3]); sigmoid gates
    gates = jax.nn.sigmoid(
        jnp.dot(y, w23_ref[...], preferred_element_type=jnp.float32) + b23_ref[...])
    gh = gates[:NH, :oup]                            # (N*H, C)  varies with h (conv2)
    gw = gates[NH:, oup:]                            # (N*W, C)  varies with w (conv3)

    # expand gates back to the lane-dense (N*H, W*C) layout
    gh_exp = jnp.dot(gh, ssum_t, preferred_element_type=jnp.float32)
    gw_full = jnp.dot(gw, ssum_t, preferred_element_type=jnp.float32) * mask
    gw_exp = jnp.dot(hexp_ref[...], gw_full, preferred_element_type=jnp.float32)

    # identity * x_w * x_h  + fused residual (+ x1)
    o_ref[...] = x * gw_exp * gh_exp + res_ref[...]


def cma_variant_residual(x_nchw, res_nchw, se_params):
    """CMA_variant(x) + res,  x/res: (N, C, H, W) -> (N, C, H, W)."""
    N, C, H, W = x_nchw.shape
    w1, b1, g1, be1, w23, b23 = se_params
    oup = w23.shape[1] // 2
    assert oup == C

    x2d = x_nchw.transpose(0, 2, 3, 1).reshape(N * H, W * C)
    res2d = res_nchw.transpose(0, 2, 3, 1).reshape(N * H, W * C)

    eye_c = jnp.eye(C, dtype=jnp.float32)
    ssum = jnp.kron(jnp.ones((W, 1), jnp.float32), eye_c)               # (W*C, C)
    ssum_t = ssum.T                                                     # (C, W*C)
    hpool = jnp.kron(jnp.eye(N, dtype=jnp.float32),
                     jnp.ones((W, H), jnp.float32) / H)                 # (N*W, N*H)
    mask = jnp.tile(jnp.kron(jnp.eye(W, dtype=jnp.float32),
                             jnp.ones((1, C), jnp.float32)), (N, 1))    # (N*W, W*C)
    hexp = jnp.kron(jnp.eye(N, dtype=jnp.float32),
                    jnp.ones((H, W), jnp.float32))                      # (N*H, N*W)

    out2d = pl.pallas_call(
        functools.partial(_cma_kernel, NH=N * H, W=W, oup=oup),
        out_shape=jax.ShapeDtypeStruct((N * H, W * C), jnp.float32),
        in_specs=_full_vmem_specs(13),
        out_specs=pl.BlockSpec(memory_space=pltpu.MemorySpace.VMEM),
    )(x2d, res2d, ssum, ssum_t, hpool, mask, hexp,
      w1, b1, g1, be1, w23, b23)

    return out2d.reshape(N, H, W, C).transpose(0, 3, 1, 2)


# ---------------------------------------------------------------------------
# Parameters (deterministic synthetic init, mirroring the module's __init__)
# ---------------------------------------------------------------------------
def make_params(channel, key):
    def conv_block(k, cin, cout, ksize):
        k1, k2, k3, k4 = jax.random.split(k, 4)
        w = 0.1 * jax.random.normal(k1, (cout, cin) + tuple(ksize), jnp.float32)
        b = 0.1 * jax.random.normal(k2, (cout,), jnp.float32)
        g = 1.0 + 0.1 * jax.random.normal(k3, (cout,), jnp.float32)
        be = 0.1 * jax.random.normal(k4, (cout,), jnp.float32)
        return (w, b, g, be)

    keys = jax.random.split(key, 5)
    params = {
        "conv_down": conv_block(keys[0], channel, channel, (1, 3, 3)),
        "conv_up":   conv_block(keys[1], channel, channel, (3, 3, 3)),
        "conv_cat1": conv_block(keys[2], channel, channel, (3, 3, 3)),
        "conv_cat2": conv_block(keys[3], channel, channel, (1, 1, 1)),
    }
    inp = oup = 2 * channel
    mip = max(8, inp // 1)
    k = jax.random.split(keys[4], 8)
    w1 = 0.1 * jax.random.normal(k[0], (mip, inp), jnp.float32)   # conv1 (1x1)
    b1 = 0.1 * jax.random.normal(k[1], (mip,), jnp.float32)
    g1 = 1.0 + 0.1 * jax.random.normal(k[2], (mip,), jnp.float32)
    be1 = 0.1 * jax.random.normal(k[3], (mip,), jnp.float32)
    w2 = 0.1 * jax.random.normal(k[4], (oup, mip), jnp.float32)   # conv2 (1x1)
    b2 = 0.1 * jax.random.normal(k[5], (oup,), jnp.float32)
    w3 = 0.1 * jax.random.normal(k[6], (oup, mip), jnp.float32)   # conv3 (1x1)
    b3 = 0.1 * jax.random.normal(k[7], (oup,), jnp.float32)
    params["se"] = (
        w1.T,                                                    # (inp, mip)
        b1.reshape(1, -1), g1.reshape(1, -1), be1.reshape(1, -1),
        jnp.concatenate([w2.T, w3.T], axis=1),                   # (mip, 2*oup)
        jnp.concatenate([b2, b3]).reshape(1, -1),                # (1, 2*oup)
    )
    return params


# ---------------------------------------------------------------------------
# AFCF2 forward
# ---------------------------------------------------------------------------
def afcf2_forward(params, x0, x1, x2):
    # conv_down(x0): kernel [1,3,3], stride [1,2,2], padding [0,1,1]
    x0_down = conv3d_bn_relu(x0, params["conv_down"],
                             stride=(1, 2, 2), padding=(0, 1, 1))

    # bilinear x2 upsample of the flattened x2, then conv_up (3x3x3, pad 1)
    B, C, T, H2, W2 = x2.shape
    x2_flat_up = bilinear_upsample_x2(x2.reshape(B, C * T, H2, W2))
    x2_up = x2_flat_up.reshape(B, C, T, 2 * H2, 2 * W2)
    x2_upconv = conv3d_bn_relu(x2_up, params["conv_up"],
                               stride=(1, 1, 1), padding=(1, 1, 1))

    # feat2 = x0_down + x1 + x2_upconv   (left to XLA: fuses into conv_cat's im2col prep)
    feat2 = x0_down + x1 + x2_upconv

    # conv_cat: BasicConv3d(3x3x3, pad 1) with the 1x1x1 BasicConv3d fused in-kernel
    feat2 = conv3d_bn_relu(feat2, params["conv_cat1"],
                           stride=(1, 1, 1), padding=(1, 1, 1),
                           conv2=params["conv_cat2"])

    # SE = CMA_variant on the (B, C*T, H, W) view, with the residual (+x1) fused
    B, C, T, H, W = feat2.shape
    out_flat = cma_variant_residual(feat2.reshape(B, C * T, H, W),
                                    x1.reshape(B, C * T, H, W),
                                    params["se"])
    return out_flat.reshape(B, C, T, H, W)


if __name__ == "__main__":
    channel = 4         # C
    B, T = 2, 2         # T must be 2 so that C*T == 2*channel (as in the module)
    H1 = W1 = 8         # spatial size of x1 (mid level)

    key = jax.random.PRNGKey(0)
    kx0, kx1, kx2, kp = jax.random.split(key, 4)
    x0 = jax.random.normal(kx0, (B, channel, T, 2 * H1, 2 * W1), jnp.float32)
    x1 = jax.random.normal(kx1, (B, channel, T, H1, W1), jnp.float32)
    x2 = jax.random.normal(kx2, (B, channel, T, H1 // 2, W1 // 2), jnp.float32)

    params = make_params(channel, kp)
    out = afcf2_forward(params, x0, x1, x2)
    jax.block_until_ready(out)
    assert out.shape == x1.shape and out.dtype == jnp.float32
    print("KERNEL_OK")
</pallas_src>

<mosaic_0001>
module attributes {stable_mosaic.version = 11 : i64} {
  func.func @_conv_bn_relu_kernel(%arg0: i32, %arg1: memref<36x128xf32, #tpu.memory_space<vmem>>, %arg2: memref<4x36xf32, #tpu.memory_space<vmem>>, %arg3: memref<4x1xf32, #tpu.memory_space<vmem>>, %arg4: memref<4x1xf32, #tpu.memory_space<vmem>>, %arg5: memref<4x1xf32, #tpu.memory_space<vmem>>, %arg6: memref<2x4x128xf32, #tpu.memory_space<vmem>>) attributes {dimension_semantics = [#tpu.dimension_semantics<arbitrary>], iteration_bounds = array<i64: 2>, scalar_prefetch = 0 : i64, scratch_operands = 0 : i64, tpu.core_type = #tpu.core_type<tc>, window_params = [{transform_indices = @transform_0, window_bounds = array<i64: 36, 128>}, {pipeline_mode = #tpu.pipeline_mode<synchronous>, transform_indices = @transform_1, window_bounds = array<i64: 4, 36>}, {pipeline_mode = #tpu.pipeline_mode<synchronous>, transform_indices = @transform_2, window_bounds = array<i64: 4, 1>}, {pipeline_mode = #tpu.pipeline_mode<synchronous>, transform_indices = @transform_3, window_bounds = array<i64: 4, 1>}, {pipeline_mode = #tpu.pipeline_mode<synchronous>, transform_indices = @transform_4, window_bounds = array<i64: 4, 1>}, {pipeline_mode = #tpu.pipeline_mode<synchronous>, transform_indices = @transform_5, window_bounds = array<i64: 2, 4, 128>}]} {
    %c0 = arith.constant 0 : index
    %c0_0 = arith.constant 0 : index
    %0 = vector.load %arg2[%c0, %c0_0] : memref<4x36xf32, #tpu.memory_space<vmem>>, vector<4x36xf32>
    %c0_1 = arith.constant 0 : index
    %c0_2 = arith.constant 0 : index
    %1 = vector.load %arg1[%c0_1, %c0_2] : memref<36x128xf32, #tpu.memory_space<vmem>>, vector<36x128xf32>
    %cst = arith.constant dense<0.000000e+00> : vector<4x128xf32>
    %2 = tpu.matmul %0, %1, %cst {dimension_numbers = #tpu.dot_dimension_numbers<[1], [0], [0], [1], [0, 0, 1, 1], [], []>} : vector<4x36xf32>, vector<36x128xf32>, vector<4x128xf32> -> vector<4x128xf32>
    %c0_3 = arith.constant 0 : index
    %c0_4 = arith.constant 0 : index
    %3 = vector.load %arg3[%c0_3, %c0_4] : memref<4x1xf32, #tpu.memory_space<vmem>>, vector<4x1xf32>
    %4 = vector.broadcast %3 : vector<4x1xf32> to vector<4x128xf32>
    %5 = arith.addf %2, %4 : vector<4x128xf32>
    %6 = arith.index_cast %arg0 : i32 to index
    %c0_5 = arith.constant 0 : index
    %c0_6 = arith.constant 0 : index
    %7 = vector.load %arg6[%6, %c0_5, %c0_6] : memref<2x4x128xf32, #tpu.memory_space<vmem>>, vector<1x4x128xf32>
    %8 = vector.shape_cast %7 : vector<1x4x128xf32> to vector<4x128xf32>
    %9 = vector.shape_cast %5 : vector<4x128xf32> to vector<1x4x128xf32>
    tpu.vector_store %arg6[%6, %c0_5, %c0_6], %9 {strides = array<i32>} : memref<2x4x128xf32, #tpu.memory_space<vmem>>, vector<1x4x128xf32>,
    %c1_i32 = arith.constant 1 : i32
    %10 = arith.cmpi eq, %arg0, %c1_i32 : i32
    %11 = arith.extui %10 : i1 to i32
    %c0_i32 = arith.constant 0 : i32
    %12 = arith.cmpi ne, %11, %c0_i32 : i32
    scf.if %12 {
      %c0_7 = arith.constant 0 : index
      %c0_8 = arith.constant 0 : index
      %c0_9 = arith.constant 0 : index
      %13 = vector.load %arg6[%c0_7, %c0_8, %c0_9] : memref<2x4x128xf32, #tpu.memory_space<vmem>>, vector<2x4x128xf32>
      %c0_10 = arith.constant 0 : index
      %c0_11 = arith.constant 0 : index
      %14 = vector.load %arg4[%c0_10, %c0_11] : memref<4x1xf32, #tpu.memory_space<vmem>>, vector<4x1xf32>
      %c0_12 = arith.constant 0 : index
      %c0_13 = arith.constant 0 : index
      %15 = vector.load %arg5[%c0_12, %c0_13] : memref<4x1xf32, #tpu.memory_space<vmem>>, vector<4x1xf32>
      %cst_14 = arith.constant dense<0.000000e+00> : vector<2x4xf32>
      %16 = vector.multi_reduction <add>, %13, %cst_14 [2] : vector<2x4x128xf32> to vector<2x4xf32>
      %17 = vector.shape_cast %16 : vector<2x4xf32> to vector<2x4x1xf32>
      %cst_15 = arith.constant dense<0.000000e+00> : vector<4x1xf32>
      %18 = vector.multi_reduction <add>, %17, %cst_15 [0] : vector<2x4x1xf32> to vector<4x1xf32>
      %19 = vector.shape_cast %18 : vector<4x1xf32> to vector<1x4x1xf32>
      %cst_16 = arith.constant 2.560000e+02 : f32
      %20 = vector.broadcast %cst_16 : f32 to vector<1x4x1xf32>
      %21 = arith.divf %19, %20 : vector<1x4x1xf32>
      %22 = vector.broadcast %21 : vector<1x4x1xf32> to vector<2x4x128xf32>
      %23 = arith.subf %13, %22 : vector<2x4x128xf32>
      %24 = arith.mulf %23, %23 : vector<2x4x128xf32>
      %cst_17 = arith.constant dense<0.000000e+00> : vector<2x4xf32>
      %25 = vector.multi_reduction <add>, %24, %cst_17 [2] : vector<2x4x128xf32> to vector<2x4xf32>
      %26 = vector.shape_cast %25 : vector<2x4xf32> to vector<2x4x1xf32>
      %cst_18 = arith.constant dense<0.000000e+00> : vector<4x1xf32>
      %27 = vector.multi_reduction <add>, %26, %cst_18 [0] : vector<2x4x1xf32> to vector<4x1xf32>
      %28 = vector.shape_cast %27 : vector<4x1xf32> to vector<1x4x1xf32>
      %cst_19 = arith.constant 2.560000e+02 : f32
      %29 = vector.broadcast %cst_19 : f32 to vector<1x4x1xf32>
      %30 = arith.divf %28, %29 : vector<1x4x1xf32>
      %cst_20 = arith.constant 9.99999974E-6 : f32
      %31 = vector.broadcast %cst_20 : f32 to vector<1x4x1xf32>
      %32 = arith.addf %30, %31 : vector<1x4x1xf32>
      %33 = math.rsqrt %32 : vector<1x4x1xf32>
      %34 = vector.broadcast %33 : vector<1x4x1xf32> to vector<2x4x128xf32>
      %35 = arith.mulf %23, %34 : vector<2x4x128xf32>
      %36 = vector.shape_cast %14 : vector<4x1xf32> to vector<1x4x1xf32>
      %37 = vector.broadcast %36 : vector<1x4x1xf32> to vector<2x4x128xf32>
      %38 = arith.mulf %35, %37 : vector<2x4x128xf32>
      %39 = vector.shape_cast %15 : vector<4x1xf32> to vector<1x4x1xf32>
      %40 = vector.broadcast %39 : vector<1x4x1xf32> to vector<2x4x128xf32>
      %41 = arith.addf %38, %40 : vector<2x4x128xf32>
      %cst_21 = arith.constant 0.000000e+00 : f32
      %42 = vector.broadcast %cst_21 : f32 to vector<2x4x128xf32>
      %43 = arith.maximumf %41, %42 : vector<2x4x128xf32>
      %c0_22 = arith.constant 0 : index
      %c0_23 = arith.constant 0 : index
      %c0_24 = arith.constant 0 : index
      %44 = vector.load %arg6[%c0_22, %c0_23, %c0_24] : memref<2x4x128xf32, #tpu.memory_space<vmem>>, vector<2x4x128xf32>
      tpu.vector_store %arg6[%c0_22, %c0_23, %c0_24], %43 {strides = array<i32>} : memref<2x4x128xf32, #tpu.memory_space<vmem>>, vector<2x4x128xf32>,
    } else {
    }
    return
  }
  func.func @transform_0(%arg0: i32) -> (i32, i32) {
    %c0_i32 = arith.constant 0 : i32
    %c0_i32_0 = arith.constant 0 : i32
    return %c0_i32, %arg0 : i32, i32
  }
  func.func @transform_1(%arg0: i32) -> (i32, i32) {
    %c0_i32 = arith.constant 0 : i32
    %c0_i32_0 = arith.constant 0 : i32
    %c0_i32_1 = arith.constant 0 : i32
    return %c0_i32, %c0_i32_0 : i32, i32
  }
  func.func @transform_2(%arg0: i32) -> (i32, i32) {
    %c0_i32 = arith.constant 0 : i32
    %c0_i32_0 = arith.constant 0 : i32
    %c0_i32_1 = arith.constant 0 : i32
    return %c0_i32, %c0_i32_0 : i32, i32
  }
  func.func @transform_3(%arg0: i32) -> (i32, i32) {
    %c0_i32 = arith.constant 0 : i32
    %c0_i32_0 = arith.constant 0 : i32
    %c0_i32_1 = arith.constant 0 : i32
    return %c0_i32, %c0_i32_0 : i32, i32
  }
  func.func @transform_4(%arg0: i32) -> (i32, i32) {
    %c0_i32 = arith.constant 0 : i32
    %c0_i32_0 = arith.constant 0 : i32
    %c0_i32_1 = arith.constant 0 : i32
    return %c0_i32, %c0_i32_0 : i32, i32
  }
  func.func @transform_5(%arg0: i32) -> (i32, i32, i32) {
    %c0_i32 = arith.constant 0 : i32
    %c0_i32_0 = arith.constant 0 : i32
    %c0_i32_1 = arith.constant 0 : i32
    %c0_i32_2 = arith.constant 0 : i32
    return %c0_i32, %c0_i32_0, %c0_i32_1 : i32, i32, i32
  }
}

</mosaic_0001>

<bundles_post_ra>
// kernel: tpu_custom_call.1
= control target key start
LH: loop header
LB: loop body
LE: loop exit
PB: predicated region body
PF: predicated region fallthrough
CT: control target
= control target key end

     0   :  { %10 = vsyncpa [#allocation3], 0  ;;  %s825_s0 = inlined_call_operand.hbm [shape: f32[36,256], index: 0, kind: input, shape index: {}]   ;;  %s826_s1 = inlined_call_operand.vmem [shape: f32[4,36], index: 1, kind: input, shape index: {}]   ;;  %s827_s2 = inlined_call_operand.vmem [shape: f32[4,1], index: 2, kind: input, shape index: {}]   ;;  %s828_s3 = inlined_call_operand.vmem [shape: f32[4,1], index: 3, kind: input, shape index: {}]   ;;  %s829_s4 = inlined_call_operand.vmem [shape: f32[4,1], index: 4, kind: input, shape index: {}]   ;;  %s830_s5 = inlined_call_operand.hbm [shape: f32[2,4,128], index: 5, kind: output, shape index: {}]  }
   0x1   :  { %12 = vsyncpa [#allocation3 + $0x1], 0 }
   0x2   :  { %13 = vsyncpa [#allocation4], 0  ;;  %s678_s18 = smov 0   ;;  %s680_s19 = smov 0  }
   0x3   :  { %s682_s20 = smov 0   ;;  %s684_s21 = smov 0  }
   0x4 LB: > { %s697_s22 = sadd.s32 4294967295, %s634_s21   ;;  %s700_s23 = sadd.s32 1, %s634_s21   ;;  %s634_s21 = sphi %s684_s21, %s836_s21   ;;  %s630_s20 = sphi %s682_s20, %s835_s20   ;;  %s626_s19 = sphi %s680_s19, %s834_s19   ;;  %s622_s18 = sphi %s678_s18, %s833_s18  }
   0x5   : > { %s23_s24 = ssub.s32 %s634_s21, %s700_s23  ;;  %s26_s25 = sadd.s32 1, %s630_s20 }
   0x6   : > { %p24_p0 = scmp.eq.s32.totalorder %s23_s24, 0  ;;  %p33_p1 = scmp.ne.s32.totalorder %s630_s20, %s626_s19 }
   0x7   : > { %p34_p2 = scmp.eq.s32.totalorder %s634_s21, 0  ;;  %p39_p3 = scmp.ne.s32.totalorder %s626_s19, %s622_s18 }
   0x8   : > { %s710_s26 = scalar_select %p24_p0, %s630_s20, %s26_s25  }
   0x9   : > { %p35_p4 = por %p34_p2, %p33_p1  ;;  %p40_p5 = scmp.eq.s32.totalorder %s697_s22, 0 }
   0xa   : > { %p489_p6 = scmp.lt.s32.totalorder %s634_s21, 2  ;;  %s180_s28 = sand.u32 1, %s630_s20  }
   0xb   : > { %p714_p7 = por %p40_p5, %p39_p3  ;;  %s477_s29 = smul.u32 40, %s180_s28 }
   0xc   : > { %s442_s30 = sshll.u32 %s634_s21, 7  ;;  %p720_p8 = pnand %p489_p6, %p35_p4 }
   0xd   : > { %s727_s9 = scalar_lea.hbm %s825_s0, %s442_s30  ;;  %s184_s10 = scalar_lea.vmem [#allocation2], %s477_s29 }
   0xe   : > { %s190_s11 = sshll.u32 %s184_s10, 4  ;;  %s731_s12 = scalar_lea.sflag [#allocation3], %s180_s28  ;;  %s729_s11 = int_to_ptr.vmem [resolvable:$true] %s190_s11 }
   0xf   : > { %s540_s13 = scalar_lea.hbm %s727_s9, 640  ;;  %p542_p10 = pneg %p720_p8 }
  0x10   : > { %p541_p9 = scmp.ne.s32.totalorder %s727_s9, %s540_s13  ;;  %s545_s16 = scalar_lea.hbm %s825_s0, 1280 }
  0x11   : > { %p546_p13 = scmp.lt.u32.totalorder %s727_s9, %s825_s0  ;;  %p547_p0 = scmp.lt.u32.totalorder %s545_s16, %s540_s13 }
  0x12   : > { %p543_p11 = pnand %p542_p10, %p541_p9  ;;  %p549_p2 = scmp.lt.u32.totalorder %s540_s13, %s727_s9 }
  0x13   : > { %p548_p1 = por %p547_p0, %p546_p13 }
  0x14   : > { %p544_p12 = pneg %p543_p11 }
  0x15   : > { %p550_p3 = por %p549_p2, %p548_p1 }
  0x17   : > { %p551_p4 = pnand %p550_p3, %p544_p12 }
  0x19   : > { %554 = shalt.err (!%p551_p4)
}
  0x1a   : > { %s555_s24 = scalar_lea.vmem %s729_s11, 640  ;;  %s636_s25 = smov [#allocation2]  }
  0x1b   : > { %p556_p5 = scmp.ne.s32.totalorder %s729_s11, %s555_s24  ;;  %s560_s28 = sshll.u32 %s636_s25, 4  ;;  %s561_s28 = int_to_ptr.vmem [resolvable:$false] %s560_s28 }
  0x1c   : > { %s562_s29 = scalar_lea.vmem %s561_s28, 1280  ;;  %p563_p11 = scmp.lt.s32.totalorder %s729_s11, %s561_s28 }
  0x1d   : > { %p558_p6 = pnand %p556_p5, %p542_p10  ;;  %p564_p13 = scmp.lt.s32.totalorder %s562_s29, %s555_s24 }
  0x1f   : > { %p559_p9 = pneg %p558_p6  ;;  %p565_p0 = por %p564_p13, %p563_p11 }
  0x21   : > { %p566_p1 = pnand %p565_p0, %p559_p9 }
  0x23   : > { %569 = shalt.err (!%p566_p1)
}
  0x24   : > { %s637_s30 = smov 256   ;;  %s638_s7 = smov 128  }
  0x25   : > { %s639_s8 = smov 8   ;;  %p443_p10 = scmp.ge.s32.totalorder %s634_s21, 1 }
  0x26   : > { %488 = dma.hbm_to_vmem [thread:$0]  (!%p720_p8), %s727_s9, 640, %s729_s11, %s731_s12, %s637_s30, %s638_s7, %s639_s8  }
  0x27   : > { %p198_p12 = scmp.lt.s32.totalorder %s634_s21, 3 }
  0x29   : > { %p199_p2 = pnand %p443_p10, %p198_p12 }
  0x2a   : > { %s204_s10 = sand.u32 (!%p199_p2), 1, %s626_s19  }
  0x2b   : > { %202 = sbr.rel (%p199_p2) target bundleno = 642 (0x282), region = 40  ;;  %s205_s14 = scalar_lea.sflag (!%p199_p2), [#allocation3], %s204_s10 }
  0x2c   : > { %s478_s13 = smul.u32 (!%p199_p2), 40, %s204_s10 }
  0x2e   : > { %s208_s15 = scalar_lea.vmem (!%p199_p2), [#allocation2], %s478_s13 }
  0x32   : > { %613 = dma.done.wait (%p714_p7), %s205_s14, 640  }
  0x33   : > { %615 = vsyncadd (%p714_p7), %s205_s14, 4294966656  ;;  %v640_v0 = vmov 0.0|0.0   ;;  %vm641_vm0 = vmmov 0   ;;  %v642_v1 = vmov 0.0   ;;  %v643_v2 = vmov 0   ;;  %v231_v3 = vld [vmem:[%s208_s15] sm:$0xff] }
  0x34   : > { %471 = vmatprep.subr.bf16.mxu0 %v640_v0  ;;  %468 = vmatprep.mubr.msk.f32.mxu0 %vm641_vm0, %v642_v1  ;;  %v232_v4 = vld [vmem:[%s208_s15 + $0x8] sm:$0xff]  ;;  %v233_v5 = vld [vmem:[%s208_s15 + $0x10] sm:$0xff]  ;;  %v234_v7 = vld [vmem:[%s208_s15 + $0x18] sm:$0xff]  ;;  %vm246_vm1 = vcmask 1043456   ;;  %vm242_vm2 = vcmask 293888   ;;  %s446_s11 = sshll.u32 %s697_s22, 2 }
  0x35   : > { %535 = vset.pattern.permute.xlu0 %v643_v2  ;;  %v472_v6 = vpack.c.bf16 %v232_v4, %v231_v3  ;;  %v236_v8 = vld [vmem:[%s827_s2] sm:$0xf]  ;;  %v475_v9 = vpack.c.bf16 %v234_v7, %v233_v5  ;;  %s321_s12 = scalar_lea.vmem [#allocation5], %s446_s11  ;;  %p447_p7 = scmp.ne.s32.totalorder %s697_s22, 1 }
  0x36   : > { %239 = vperm.xlu0 %535, %v236_v8   ;;  %v235_v10 = vld [vmem:[%s208_s15 + $0x20] sm:$0xf]  ;;  %v644_v21 = vmov (!%p447_p7), 0  }
  0x37   : > { %473 = vmatpush3.bf16.msra.mxu0 %v472_v6  ;;  %v230_v11 = vld [vmem:[%s826_s1] sm:$0xf]  ;;  %537 = vset.pattern.permute.xlu1 (!%p447_p7), %v644_v21 }
  0x38   : > { %474 = vmatprep.subr.bf16.mxu0 %v640_v0  ;;  %v329_v20 = vld [vmem:[%s828_s3] sm:$0xf] (!%p447_p7) }
  0x39   : > { %v330_v34 = vld [vmem:[%s829_s4] sm:$0xf] (!%p447_p7) }
  0x3a   : > { %536 = vset.pattern.permute.xlu0 (!%p447_p7), %v644_v21 }
  0x3b   : > { %476 = vmatpush3.bf16.msra.mxu0 %v475_v9 }
  0x3c   : > { %466 = vmatprep.subr.mxu0 %v642_v1 }
  0x3f   : > { %467 = vmatpush3.msk.msra.mxu0 %vm246_vm1, %v235_v10 }
  0x40   : > { %469 = vmatmul.mubr.msk.f32.vlgmr.msra.gmra.mrb[0].mxu0 %vm242_vm2, %v230_v11 }
  0xb5   : > { %v240_v12 = vpop.permute.xlu0 %239 }
 0x110   : > { %326 = sbr.rel (%p447_p7) target bundleno = 616 (0x268), region = 48 }
 0x113   : > { %v316_v13 = vpop.f32.mrb[0].mxu0 }
 0x114   : > { %v317_v14 = vadd.f32 %v316_v13, %v240_v12  ;;  %v470_v15 = vpop.f32.mrb[1].mxu0 }
 0x116   : > { %322 = vst [vmem:[%s321_s12] sm:$0xf] %v317_v14 }
 0x11d   : > { %v327_v16 = vld [vmem:[#allocation5] sm:$0xf]  ;;  %v328_v17 = vld [vmem:[#allocation5 + $0x4] sm:$0xf] }
 0x11e   : > { %v331_v18 = vsel %vm246_vm1, %v327_v16, 0.0  ;;  %v334_v19 = vsel %vm246_vm1, %v328_v17, 0.0 }
 0x11f   : > { %332 = vadd.xlane.f32.xlu0 %v331_v18 }
 0x123   : > { %335 = vadd.xlane.f32.xlu0 %v334_v19 }
 0x139   : > { %362 = vperm.xlu0 %536, %v329_v20  }
 0x1ac   : > { %v333_v22 = vpop.xlane.xlu0 %332 }
 0x1ad   : > { %v337_v24 = vsel %vm246_vm1, %v333_v22, 0.0 }
 0x1b0   : > { %v336_v23 = vpop.xlane.xlu0 %335 }
 0x1b1   : > { %v338_v25 = vsel %vm246_vm1, %v336_v23, 0.0 }
 0x1b2   : > { %v339_v26 = vadd.f32 %v338_v25, %v337_v24 }
 0x1b4   : > { %v341_v27 = vmul.f32 0.00390625, %v339_v26 }
 0x1b6   : > { %v342_v28 = vsub.f32 %v327_v16, %v341_v27  ;;  %v343_v29 = vsub.f32 %v328_v17, %v341_v27 }
 0x1b8   : > { %v344_v30 = vmul.f32 %v342_v28, %v342_v28  ;;  %v345_v32 = vmul.f32 %v343_v29, %v343_v29  ;;  %v363_v43 = vpop.permute.xlu0 %362 }
 0x1ba   : > { %v346_v31 = vsel %vm246_vm1, %v344_v30, 0.0  ;;  %v349_v33 = vsel %vm246_vm1, %v345_v32, 0.0 }
 0x1bb   : > { %347 = vadd.xlane.f32.xlu1 %v346_v31 }
 0x1bf   : > { %350 = vadd.xlane.f32.xlu1 %v349_v33 }
 0x1d0   : > { %369 = vperm.xlu1 %537, %v330_v34  }
 0x248   : > { %v348_v35 = vpop.xlane.xlu1 %347 }
 0x249   : > { %v352_v37 = vsel %vm246_vm1, %v348_v35, 0.0 }
 0x24c   : > { %v351_v36 = vpop.xlane.xlu1 %350 }
 0x24d   : > { %v353_v38 = vsel %vm246_vm1, %v351_v36, 0.0 }
 0x24e   : > { %v354_v39 = vadd.f32 %v353_v38, %v352_v37 }
 0x250   : > { %v355_v40 = vmul.f32 0.00390625, %v354_v39  ;;  %v370_v46 = vpop.permute.xlu1 %369 }
 0x252   : > { %v356_v41 = vadd.f32 1e-05, %v355_v40 }
 0x254   : > { %538 = vrsqrt.f32 %v356_v41 }
 0x25e   : > { %v539_v42 = vpop.eup %538 }
 0x25f   : > { %v358_v44 = vmul.f32 %v539_v42, %v342_v28  ;;  %v359_v45 = vmul.f32 %v539_v42, %v343_v29 }
 0x261   : > { %v365_v47 = vmul.f32 %v363_v43, %v358_v44  ;;  %v366_v48 = vmul.f32 %v363_v43, %v359_v45 }
 0x263   : > { %v372_v49 = vadd.f32 %v370_v46, %v365_v47  ;;  %v373_v50 = vadd.f32 %v370_v46, %v366_v48 }
 0x265   : > { %v374_v51 = vmax.f32 %v372_v49, 0.0  ;;  %v375_v52 = vmax.f32 %v373_v50, 0.0 }
 0x267   : > { %376 = vst [vmem:[#allocation5] sm:$0xf] %v374_v51  ;;  %377 = vst [vmem:[#allocation5 + $0x4] sm:$0xf] %v375_v52 }
 0x268 PF: > { %p490_p8 = scmp.eq.s32.totalorder %s697_s22, 1  ;;  %s645_s25 = smov [#allocation5]  }
 0x269   : > { %s384_s28 = sshll.u32 %s645_s25, 4  ;;  %s385_s28 = int_to_ptr.vmem [resolvable:$true] %s384_s28 }
 0x26a   : > { %s570_s29 = scalar_lea.vmem %s385_s28, 128  ;;  %p577_p6 = scmp.lt.s32.totalorder %s385_s28, %s385_s28 }
 0x26b   : > { %p571_p3 = scmp.ne.s32.totalorder %s385_s28, %s570_s29  ;;  %p578_p9 = scmp.lt.s32.totalorder %s570_s29, %s570_s29 }
 0x26d   : > { %p572_p4 = pnand %p571_p3, %p490_p8  ;;  %p579_p11 = por %p578_p9, %p577_p6 }
 0x26f   : > { %p573_p5 = pneg %p572_p4 }
 0x271   : > { %p580_p13 = pnand %p579_p11, %p573_p5 }
 0x273   : > { %583 = shalt.err (!%p580_p13)
}
 0x274   : > { %s584_s8 = scalar_lea.hbm %s830_s5, 128 }
 0x275   : > { %p585_p0 = scmp.ne.s32.totalorder %s830_s5, %s584_s8  ;;  %p590_p12 = scmp.lt.u32.totalorder %s584_s8, %s830_s5 }
 0x277   : > { %p586_p1 = pnand %p585_p0, %p490_p8 }
 0x279   : > { %p587_p10 = pneg %p586_p1 }
 0x27b   : > { %p592_p2 = pnand %p590_p12, %p587_p10 }
 0x27d   : > { %595 = shalt.err (!%p592_p2)
}
 0x27e   : > { %s646_s21 = smov 64   ;;  %s647_s6 = smov 4  }
 0x27f   : > { %482 = dma.vmem_to_hbm [thread:$0]  (%p490_p8), %s385_s28, 128, %s830_s5, [#allocation4], %s646_s21, %s646_s21, %s647_s6  }
 0x280   : > { %617 = dma.done.wait (%p490_p8), [#allocation4], 128  }
 0x281   : > { %619 = vsyncadd (%p490_p8), [#allocation4], 4294967168 }
 0x282 PF: > { %p16_p7 = scmp.ge.s32.totalorder %s700_s23, 4   ;;  %s833_s18 = smov %s626_s19 }
 0x283   : > { %s834_s19 = smov %s630_s20  ;;  %s835_s20 = smov %s710_s26 }
 0x284   : > { %s836_s21 = smov %s700_s23  ;;  %18 = sbr.rel (!%p16_p7) target bundleno = 4 (0x4), region = 82 }
 0x28b   :  { %400 = vsyncpa [#allocation3], 1 }
 0x28c   :  { %402 = vsyncpa [#allocation3 + $0x1], 1 }
 0x28d   :  { %403 = vsyncpa [#allocation4], 1 }
 0x28e   :  { %405 = vsyncpa [#allocation4 + $0x1], 1 }

</bundles_post_ra>
